<compile_context>
chip_gen: v7x
topology: tpu7x:2x2x1
jax: 0.10.0
libtpu: 0.0.40
codegen_flags: <defaults>
</compile_context>

<pallas_src>
import functools

import jax
import jax.numpy as jnp
from jax.experimental import pallas as pl
from jax.experimental.pallas import tpu as pltpu


def _round_up(x, m):
    return (x + m - 1) // m * m


def _layernorm_kernel(z_ref, a_ref, b_ref, o_ref, *, eps, hidden_size):
    # z_ref: (block_rows, H) tile of rows; a_ref/b_ref: (1, H) affine params.
    z = z_ref[...].astype(jnp.float32)

    n = jnp.float32(hidden_size)
    mu = jnp.sum(z, axis=1, keepdims=True) / n

    # Two-pass variance (no E[x^2]-mu^2) to avoid f32 cancellation.
    diff = z - mu
    # torch.std is unbiased (divides by N-1); guard hidden_size == 1.
    var = jnp.sum(diff * diff, axis=1, keepdims=True) / jnp.float32(
        max(hidden_size - 1, 1)
    )
    denom = jnp.sqrt(var) + jnp.float32(eps)

    # Exact per-row reciprocal (only block_rows values -> negligible), then a
    # per-element multiply instead of a per-element divide.
    inv = jnp.float32(1.0) / denom

    out = diff * inv * a_ref[...].astype(jnp.float32) + b_ref[...].astype(jnp.float32)
    o_ref[...] = out.astype(o_ref.dtype)


def _choose_block_rows(batch, hidden, dtype, target_bytes=4 << 20):
    """Row-tile heuristic.

    * one f32 compute tile ~target_bytes (mem-bound knee; fits v7x's 64 MiB
      VMEM with double-buffered in/out tiles plus f32 temporaries),
    * rounded to the packed-sublane multiple of the I/O dtype,
    * capped so large batches still produce >= ~8 grid steps (megacore
      sharding on v7x + software pipelining).
    """
    sub = max(8, 32 // jnp.dtype(dtype).itemsize)  # f32: 8, bf16: 16, int8/fp8: 32
    rows = max(sub, (target_bytes // max(hidden * 4, 1)) // sub * sub)
    min_steps = 8
    if batch > min_steps * sub:
        rows = min(rows, _round_up(pl.cdiv(batch, min_steps), sub))
    if rows >= batch:
        return batch  # a full-dim block is always a legal block shape
    return rows


def layer_normalization(z, a2, b2, *, eps=1e-5, block_rows=None):
    B, H = z.shape
    # Accept (H,) or (1, H) parameters.
    a2 = jnp.asarray(a2).reshape(1, H)
    b2 = jnp.asarray(b2).reshape(1, H)

    if block_rows is None:
        block_rows = _choose_block_rows(B, H, z.dtype)
    grid = pl.cdiv(B, block_rows)

    kernel = functools.partial(_layernorm_kernel, eps=eps, hidden_size=H)

    return pl.pallas_call(
        kernel,
        out_shape=jax.ShapeDtypeStruct((B, H), z.dtype),
        grid_spec=pltpu.PrefetchScalarGridSpec(
            num_scalar_prefetch=0,
            grid=(grid,),
            in_specs=[
                # Last dim == full hidden dim, so no padding / masking is
                # needed even when H is not a multiple of 128.
                pl.BlockSpec((block_rows, H), lambda i: (i, 0)),  # z tile
                pl.BlockSpec((1, H), lambda i: (0, 0)),           # a2 (broadcast)
                pl.BlockSpec((1, H), lambda i: (0, 0)),           # b2 (broadcast)
            ],
            out_specs=pl.BlockSpec((block_rows, H), lambda i: (i, 0)),
        ),
        compiler_params=pltpu.CompilerParams(
            dimension_semantics=("parallel",),  # rows shard across TCs on v7x
            vmem_limit_bytes=48 << 20,
        ),
    )(z, a2, b2)


def _reference(z, a2, b2, eps):
    mu = jnp.mean(z, axis=1, keepdims=True)
    sigma = jnp.std(z, axis=1, keepdims=True, ddof=1)
    return (z - mu) / (sigma + eps) * a2 + b2


if __name__ == "__main__":
    key = jax.random.PRNGKey(0)

    # Small shape matching the module's forward (batch, hidden).
    batch, hidden = 8, 32
    z = jax.random.normal(key, (batch, hidden), dtype=jnp.float32)
    a2 = jnp.ones((1, hidden), dtype=jnp.float32)   # nn.Parameter(torch.ones(1, H))
    b2 = jnp.zeros((1, hidden), dtype=jnp.float32)  # nn.Parameter(torch.zeros(1, H))

    out = jax.block_until_ready(layer_normalization(z, a2, b2, eps=1e-5))
    ref = _reference(z, a2, b2, 1e-5)
    assert jnp.allclose(out, ref, atol=1e-5, rtol=1e-5)

    # Multi-step grid (pipelined, 8 steps) with random affine parameters.
    key2, key3 = jax.random.split(key)
    z2 = jax.random.normal(key2, (64, 256), dtype=jnp.float32)
    a2b = jax.random.normal(key3, (1, 256), dtype=jnp.float32)
    b2b = jnp.full((1, 256), 0.25, dtype=jnp.float32)
    out2 = jax.block_until_ready(
        layer_normalization(z2, a2b, b2b, eps=1e-5, block_rows=8)
    )
    ref2 = _reference(z2, a2b, b2b, 1e-5)
    assert jnp.allclose(out2, ref2, atol=1e-5, rtol=1e-5)

    # H not a multiple of 128 AND B not a multiple of block_rows (partial block).
    z3 = jax.random.normal(key3, (20, 96), dtype=jnp.float32)
    a3 = jax.random.normal(key2, (1, 96), dtype=jnp.float32)
    b3 = jax.random.normal(jax.random.PRNGKey(3), (1, 96), dtype=jnp.float32)
    out3 = jax.block_until_ready(
        layer_normalization(z3, a3, b3, eps=1e-5, block_rows=8)
    )
    ref3 = _reference(z3, a3, b3, 1e-5)
    assert jnp.allclose(out3, ref3, atol=1e-5, rtol=1e-5)

    print("KERNEL_OK")
</pallas_src>

<mosaic_0001>
module attributes {stable_mosaic.version = 11 : i64} {
  func.func @_layernorm_kernel(%arg0: i32, %arg1: memref<8x32xf32, #tpu.memory_space<vmem>>, %arg2: memref<1x32xf32, #tpu.memory_space<vmem>>, %arg3: memref<1x32xf32, #tpu.memory_space<vmem>>, %arg4: memref<8x32xf32, #tpu.memory_space<vmem>>) attributes {dimension_semantics = [#tpu.dimension_semantics<parallel>], iteration_bounds = array<i64: 1>, scalar_prefetch = 0 : i64, scratch_operands = 0 : i64, tpu.core_type = #tpu.core_type<tc>, window_params = [{transform_indices = @transform_0, window_bounds = array<i64: 8, 32>}, {pipeline_mode = #tpu.pipeline_mode<synchronous>, transform_indices = @transform_1, window_bounds = array<i64: 1, 32>}, {pipeline_mode = #tpu.pipeline_mode<synchronous>, transform_indices = @transform_2, window_bounds = array<i64: 1, 32>}, {transform_indices = @transform_3, window_bounds = array<i64: 8, 32>}]} {
    %c0 = arith.constant 0 : index
    %c0_0 = arith.constant 0 : index
    %0 = vector.load %arg1[%c0, %c0_0] : memref<8x32xf32, #tpu.memory_space<vmem>>, vector<8x32xf32>
    %cst = arith.constant dense<0.000000e+00> : vector<8xf32>
    %1 = vector.multi_reduction <add>, %0, %cst [1] : vector<8x32xf32> to vector<8xf32>
    %2 = vector.shape_cast %1 : vector<8xf32> to vector<8x1xf32>
    %cst_1 = arith.constant 3.200000e+01 : f32
    %3 = vector.broadcast %cst_1 : f32 to vector<8x1xf32>
    %4 = arith.divf %2, %3 : vector<8x1xf32>
    %5 = vector.broadcast %4 : vector<8x1xf32> to vector<8x32xf32>
    %6 = arith.subf %0, %5 : vector<8x32xf32>
    %7 = arith.mulf %6, %6 : vector<8x32xf32>
    %cst_2 = arith.constant dense<0.000000e+00> : vector<8xf32>
    %8 = vector.multi_reduction <add>, %7, %cst_2 [1] : vector<8x32xf32> to vector<8xf32>
    %9 = vector.shape_cast %8 : vector<8xf32> to vector<8x1xf32>
    %cst_3 = arith.constant 3.100000e+01 : f32
    %10 = vector.broadcast %cst_3 : f32 to vector<8x1xf32>
    %11 = arith.divf %9, %10 : vector<8x1xf32>
    %12 = math.sqrt %11 : vector<8x1xf32>
    %cst_4 = arith.constant 9.99999974E-6 : f32
    %13 = vector.broadcast %cst_4 : f32 to vector<8x1xf32>
    %14 = arith.addf %12, %13 : vector<8x1xf32>
    %cst_5 = arith.constant 1.000000e+00 : f32
    %15 = vector.broadcast %cst_5 : f32 to vector<8x1xf32>
    %16 = arith.divf %15, %14 : vector<8x1xf32>
    %17 = vector.broadcast %16 : vector<8x1xf32> to vector<8x32xf32>
    %18 = arith.mulf %6, %17 : vector<8x32xf32>
    %c0_6 = arith.constant 0 : index
    %c0_7 = arith.constant 0 : index
    %19 = vector.load %arg2[%c0_6, %c0_7] : memref<1x32xf32, #tpu.memory_space<vmem>>, vector<1x32xf32>
    %20 = vector.broadcast %19 : vector<1x32xf32> to vector<8x32xf32>
    %21 = arith.mulf %18, %20 : vector<8x32xf32>
    %c0_8 = arith.constant 0 : index
    %c0_9 = arith.constant 0 : index
    %22 = vector.load %arg3[%c0_8, %c0_9] : memref<1x32xf32, #tpu.memory_space<vmem>>, vector<1x32xf32>
    %23 = vector.broadcast %22 : vector<1x32xf32> to vector<8x32xf32>
    %24 = arith.addf %21, %23 : vector<8x32xf32>
    %c0_10 = arith.constant 0 : index
    %c0_11 = arith.constant 0 : index
    %25 = vector.load %arg4[%c0_10, %c0_11] : memref<8x32xf32, #tpu.memory_space<vmem>>, vector<8x32xf32>
    tpu.vector_store %arg4[%c0_10, %c0_11], %24 {strides = array<i32>} : memref<8x32xf32, #tpu.memory_space<vmem>>, vector<8x32xf32>,
    return
  }
  func.func @transform_0(%arg0: i32) -> (i32, i32) {
    %c0_i32 = arith.constant 0 : i32
    %c0_i32_0 = arith.constant 0 : i32
    return %arg0, %c0_i32 : i32, i32
  }
  func.func @transform_1(%arg0: i32) -> (i32, i32) {
    %c0_i32 = arith.constant 0 : i32
    %c0_i32_0 = arith.constant 0 : i32
    %c0_i32_1 = arith.constant 0 : i32
    return %c0_i32, %c0_i32_0 : i32, i32
  }
  func.func @transform_2(%arg0: i32) -> (i32, i32) {
    %c0_i32 = arith.constant 0 : i32
    %c0_i32_0 = arith.constant 0 : i32
    %c0_i32_1 = arith.constant 0 : i32
    return %c0_i32, %c0_i32_0 : i32, i32
  }
  func.func @transform_3(%arg0: i32) -> (i32, i32) {
    %c0_i32 = arith.constant 0 : i32
    %c0_i32_0 = arith.constant 0 : i32
    return %arg0, %c0_i32 : i32, i32
  }
}

</mosaic_0001>

<bundles_post_ra>
// kernel: tpu_custom_call.1
= control target key start
LH: loop header
LB: loop body
LE: loop exit
PB: predicated region body
PF: predicated region fallthrough
CT: control target
= control target key end

     0   :  { %8 = vsyncpa [#allocation3], 0  ;;  %s195_s0 = inlined_call_operand.hbm [shape: f32[8,32], index: 0, kind: input, shape index: {}]   ;;  %s196_s1 = inlined_call_operand.vmem [shape: f32[1,32], index: 1, kind: input, shape index: {}]   ;;  %s197_s2 = inlined_call_operand.vmem [shape: f32[1,32], index: 2, kind: input, shape index: {}]   ;;  %s198_s3 = inlined_call_operand.hbm [shape: f32[8,32], index: 3, kind: output, shape index: {}]  }
   0x1   :  { %9 = vsyncpa [#allocation4], 0  ;;  %s140_s12 = smov [#allocation2]   ;;  %s92_s16 = scalar_lea.hbm %s195_s0, 128 }
   0x2   :  { %s16_s13 = sshll.u32 %s140_s12, 4  ;;  %p93_p0 = scmp.ne.s32.totalorder %s195_s0, %s92_s16  ;;  %s17_s13 = int_to_ptr.vmem [resolvable:$true] %s16_s13 }
   0x3   :  { %p96_p1 = scmp.lt.u32.totalorder %s92_s16, %s195_s0 }
   0x5   :  { %p98_p2 = pnand %p96_p1, %p93_p0 }
   0x7   :  { %101 = shalt.err (!%p98_p2)
}
   0x8   :  { %s102_s21 = scalar_lea.vmem %s17_s13, 128  ;;  %p107_p4 = scmp.lt.s32.totalorder %s17_s13, %s17_s13 }
   0x9   :  { %p103_p3 = scmp.ne.s32.totalorder %s17_s13, %s102_s21  ;;  %p108_p5 = scmp.lt.s32.totalorder %s102_s21, %s102_s21 }
   0xb   :  { %p109_p6 = por %p108_p5, %p107_p4 }
   0xd   :  { %p110_p7 = pnand %p109_p6, %p103_p3 }
   0xf   :  { %113 = shalt.err (!%p110_p7)
}
  0x10   :  { %19 = dma.hbm_to_vmem [thread:$0]  %s195_s0, 128, %s17_s13, [#allocation3]  }
  0x11   :  { %136 = dma.done.wait [#allocation3], 128  }
  0x12   :  { %137 = vsyncadd [#allocation3], 4294967168  ;;  %vm28_vm0 = vcmask 261120   ;;  %v27_v0 = vld [vmem:[#allocation2] sm:$0xff]  ;;  %s141_s27 = smov [#allocation5]  }
  0x13   :  { %v29_v1 = vsel %vm28_vm0, %v27_v0, 0.0  ;;  %v84_v16 = vld [vmem:[%s196_s1] ss:$0 sm:$0xff]  ;;  %s75_s28 = sshll.u32 %s141_s27, 4  ;;  %s76_s28 = int_to_ptr.vmem [resolvable:$true] %s75_s28 }
  0x14   :  { %30 = vadd.xlane.f32.xlu0 %v29_v1  ;;  %v85_v18 = vld [vmem:[%s197_s2] ss:$0 sm:$0xff]  ;;  %s114_s29 = scalar_lea.vmem %s76_s28, 128  ;;  %p119_p9 = scmp.lt.s32.totalorder %s76_s28, %s76_s28 }
  0x15   :  { %p115_p8 = scmp.ne.s32.totalorder %s76_s28, %s114_s29  ;;  %p120_p10 = scmp.lt.s32.totalorder %s114_s29, %s114_s29 }
  0x17   :  { %p121_p11 = por %p120_p10, %p119_p9 }
  0x19   :  { %p122_p12 = pnand %p121_p11, %p115_p8 }
  0xa1   :  { %v31_v2 = vpop.xlane.xlu0 %30 }
  0xa2   :  { %v33_v3 = vmul.f32 0.03125, %v31_v2 }
  0xa4   :  { %v34_v4 = vsub.f32 %v27_v0, %v33_v3 }
  0xa6   :  { %v35_v5 = vmul.f32 %v34_v4, %v34_v4 }
  0xa8   :  { %v36_v6 = vsel %vm28_vm0, %v35_v5, 0.0 }
  0xa9   :  { %37 = vadd.xlane.f32.xlu0 %v36_v6 }
 0x136   :  { %v38_v7 = vpop.xlane.xlu0 %37 }
 0x137   :  { %v40_v8 = vmul.f32 0.032258064, %v38_v7 }
 0x139   :  { %88 = vrsqrt.f32 %v40_v8  ;;  %vm43_vm1 = vcmp.eq.f32.partialorder %v40_v8, inf  ;;  %v46_v11 = vand.u32 2147483648, %v40_v8  ;;  %vm45_vm2 = vcmp.eq.f32.partialorder %v40_v8, 0.0 }
 0x143   :  { %v89_v9 = vpop.eup %88 }
 0x144   :  { %v42_v10 = vmul.f32 %v89_v9, %v40_v8 }
 0x146   :  { %v44_v12 = vsel %vm43_vm1, %v40_v8, %v42_v10 }
 0x147   :  { %v47_v13 = vsel %vm45_vm2, %v46_v11, %v44_v12 }
 0x148   :  { %v48_v14 = vadd.f32 1e-05, %v47_v13 }
 0x14a   :  { %90 = vrcp.f32 %v48_v14 }
 0x154   :  { %v91_v15 = vpop.eup %90 }
 0x155   :  { %v51_v17 = vmul.f32 %v91_v15, %v34_v4 }
 0x157   :  { %v59_v19 = vmul.f32 %v84_v16, %v51_v17 }
 0x159   :  { %v67_v20 = vadd.f32 %v85_v18, %v59_v19 }
 0x15b   :  { %68 = vst.msk [vmem:[#allocation5] sm:$0xff] %vm28_vm0, %v67_v20 }
 0x15c   :  { %125 = shalt.err (!%p122_p12)
}
 0x15d   :  { %s126_s4 = scalar_lea.hbm %s198_s3, 128 }
 0x15e   :  { %p127_p13 = scmp.ne.s32.totalorder %s198_s3, %s126_s4  ;;  %p130_p0 = scmp.lt.u32.totalorder %s126_s4, %s198_s3 }
 0x160   :  { %p132_p1 = pnand %p130_p0, %p127_p13 }
 0x162   :  { %135 = shalt.err (!%p132_p1)
}
 0x163   :  { %78 = dma.vmem_to_hbm [thread:$0]  %s76_s28, 128, %s198_s3, [#allocation4]  }
 0x164   :  { %138 = dma.done.wait [#allocation4], 128  }
 0x165   :  { %139 = vsyncadd [#allocation4], 4294967168 }
 0x166   :  { %82 = vsyncpa [#allocation3], 1 }
 0x167   :  { %83 = vsyncpa [#allocation4], 1 }

</bundles_post_ra>
